<compile_context>
chip_gen: v5e
topology: v5e:2x2
jax: 0.10.0
libtpu: 0.0.40
codegen_flags: <defaults>
</compile_context>

<pallas_src>
import functools

import jax
import jax.numpy as jnp
from jax.experimental import pallas as pl
from jax.experimental.pallas import tpu as pltpu

_LANE = 128


def _round_up(n, m):
    return ((n + m - 1) // m) * m


def _value_mlp_kernel(x_ref, w1_ref, b1_ref, w2_ref, b2_ref, w3_ref, b3_ref,
                      out_ref, *, bf16_matmul: bool):
    x = x_ref[...]
    w1 = w1_ref[...]
    w2 = w2_ref[...]
    if bf16_matmul:
        # v6e/v7x: single-pass bf16 MXU operands (f32 operands are emulated via
        # multiple bf16 passes).  Accumulation stays f32.
        x = x.astype(jnp.bfloat16)
        w1 = w1.astype(jnp.bfloat16)
        w2 = w2.astype(jnp.bfloat16)

    h1 = jnp.dot(x, w1, preferred_element_type=jnp.float32) + b1_ref[...]
    h1 = jnp.maximum(h1, 0.0)
    if bf16_matmul:
        h1 = h1.astype(jnp.bfloat16)

    h2 = jnp.dot(h1, w2, preferred_element_type=jnp.float32) + b2_ref[...]
    h2 = jnp.maximum(h2, 0.0)

    # Final Linear(H, 1), produced directly in lane-major orientation:
    # (1, H) . (TB, H)^T -> (1, TB), i.e. the batch ends up on the lane axis
    # of the output block (no skinny-vector transpose/relayout needed).
    v = jnp.einsum('ih,bh->ib', w3_ref[...], h2,
                   preferred_element_type=jnp.float32)          # (1, TB)
    v = v + b3_ref[0]                                           # scalar bias (SMEM)

    # Replicate across the 8 sublanes only -> unmasked lane-dense store,
    # ~16x less output HBM traffic than a 128-lane broadcast.  Wrapper reads
    # sublane row 0.
    out_ref[...] = jnp.broadcast_to(v, out_ref.shape)


def value_forward(x, packed_params, *, tile_b=512, num_tiles=None,
                  bf16_matmul=False):
    """x: (B, num_inputs) f32 -> (B, 1) f32 state values.

    tile_b:     max batch rows per grid step (rounded to hardware tiles).
    num_tiles:  optional hint to keep >= this many grid steps (v7x: pass 2 so
                ("parallel",) shards the batch across both TensorCores).
    bf16_matmul: use bf16 MXU operands with f32 accumulate (v6e/v7x lever).
    """
    w1p, b1p, w2p, b2p, w3p, b3p = packed_params
    B, n_in = x.shape
    _, h_pad = w1p.shape

    b8 = _round_up(B, 8)
    if num_tiles is not None and num_tiles > 1:
        # Multi-tile (e.g. v7x 2-TC) path: lane-major output blocks need a
        # 128-multiple tile so the (8, tb) block obeys the (8,128) rule.
        tb = _round_up(pl.cdiv(b8, num_tiles), _LANE)
    elif b8 <= tile_b:
        tb = b8                                  # whole batch, grid of 1
    else:
        tb = _round_up(min(tile_b, b8), _LANE)   # large B: big lane-aligned tiles

    b_pad = _round_up(B, tb)
    if num_tiles is not None and num_tiles > 1:
        b_pad = max(b_pad, num_tiles * tb)
    grid = b_pad // tb

    # Only the batch dim is ever padded, and only when needed (no feature-dim
    # pad -> no extra whole-array HBM round trip, 4x less x read traffic).
    if b_pad == B:
        x_in = jnp.asarray(x, jnp.float32)
    else:
        x_in = jnp.zeros((b_pad, n_in), jnp.float32).at[:B, :].set(
            jnp.asarray(x, jnp.float32))

    kernel = functools.partial(_value_mlp_kernel, bf16_matmul=bf16_matmul)

    out = pl.pallas_call(
        kernel,
        out_shape=jax.ShapeDtypeStruct((8, b_pad), jnp.float32),
        grid=(grid,),
        in_specs=[
            pl.BlockSpec((tb, n_in), lambda i: (i, 0)),        # x: tiled over batch
            pl.BlockSpec((n_in, h_pad), lambda i: (0, 0)),     # w1: resident
            pl.BlockSpec((1, h_pad), lambda i: (0, 0)),        # b1
            pl.BlockSpec((h_pad, h_pad), lambda i: (0, 0)),    # w2: resident
            pl.BlockSpec((1, h_pad), lambda i: (0, 0)),        # b2
            pl.BlockSpec((1, h_pad), lambda i: (0, 0)),        # w3 row vector
            pl.BlockSpec(memory_space=pltpu.MemorySpace.SMEM), # b3 scalar
        ],
        out_specs=pl.BlockSpec((8, tb), lambda i: (0, i)),     # lane-major values
        compiler_params=pltpu.CompilerParams(
            # Batch axis is embarrassingly parallel -> shards across the two
            # TensorCores on v7x when grid > 1; harmless no-op on v5e/v6e.
            dimension_semantics=("parallel",)),
    )(x_in, w1p, b1p, w2p, b2p, w3p, b3p)

    return out[0, :B][:, None]


def init_value_params(key, num_inputs, num_hidden=24):
    """Deterministic init mimicking nn.Linear's U(-1/sqrt(fan_in), 1/sqrt(fan_in)),
    with value_head.weight *= 0.1 and value_head.bias *= 0.0, in logical
    (in, out) / (out,) layout (weights pre-transposed vs. PyTorch)."""
    k1, k2, k3, k4, k5, k6 = jax.random.split(key, 6)

    def lin_init(kw, kb, fan_in, fan_out):
        bound = 1.0 / (float(fan_in) ** 0.5)
        w = jax.random.uniform(kw, (fan_in, fan_out), jnp.float32, -bound, bound)
        b = jax.random.uniform(kb, (fan_out,), jnp.float32, -bound, bound)
        return w, b

    w1, b1 = lin_init(k1, k2, num_inputs, num_hidden)
    w2, b2 = lin_init(k3, k4, num_hidden, num_hidden)
    w3, b3 = lin_init(k5, k6, num_hidden, 1)
    w3 = w3 * 0.1          # value_head.weight.data.mul_(0.1)
    b3 = b3 * 0.0          # value_head.bias.data.mul_(0.0)
    return (w1, b1, w2, b2, w3, b3)


def pack_value_params(params, lane=_LANE):
    """One-time repack of logical params into the kernel layout.  Only the
    hidden dim is zero-padded to the lane width (padding is neutral through
    relu and the final contraction); the input-feature dim is NOT padded."""
    w1, b1, w2, b2, w3, b3 = params
    n_in, n_h = w1.shape
    h_pad = _round_up(n_h, lane)

    w1p = jnp.zeros((n_in, h_pad), jnp.float32).at[:, :n_h].set(w1)
    b1p = jnp.zeros((1, h_pad), jnp.float32).at[0, :n_h].set(b1)
    w2p = jnp.zeros((h_pad, h_pad), jnp.float32).at[:n_h, :n_h].set(w2)
    b2p = jnp.zeros((1, h_pad), jnp.float32).at[0, :n_h].set(b2)
    w3p = jnp.zeros((1, h_pad), jnp.float32).at[0, :n_h].set(w3[:, 0])
    b3p = jnp.asarray(b3, jnp.float32).reshape((1,))   # scalar bias -> SMEM
    return (w1p, b1p, w2p, b2p, w3p, b3p)


def value_forward_ref(x, params):
    w1, b1, w2, b2, w3, b3 = params
    h1 = jnp.maximum(x @ w1 + b1, 0.0)
    h2 = jnp.maximum(h1 @ w2 + b2, 0.0)
    return h2 @ w3 + b3


# TODO(synk): RMSprop optimizer, MSELoss training loop and calculate_action_grad
# (autograd w.r.t. the action) are host-side training logic, not forward-pass
# kernels; only the forward pass is implemented here.

if __name__ == "__main__":
    num_inputs, num_hidden, batch = 32, 24, 64
    key = jax.random.PRNGKey(0)
    kx, kp = jax.random.split(key)
    x = jax.random.normal(kx, (batch, num_inputs), jnp.float32)

    params = init_value_params(kp, num_inputs, num_hidden)
    packed = pack_value_params(params)
    ref = value_forward_ref(x, params)

    # 1) Default f32 path: whole batch in a single grid step (no host pad).
    out = jax.block_until_ready(value_forward(x, packed))
    assert out.shape == (batch, 1)
    assert jnp.allclose(out, ref, atol=1e-5, rtol=1e-5)

    # 2) Multi-tile path (v7x hint: 2 grid steps for the two TensorCores).
    out2 = jax.block_until_ready(value_forward(x, packed, num_tiles=2))
    assert jnp.allclose(out2, ref, atol=1e-5, rtol=1e-5)

    # 3) bf16 MXU operands (recommended default on v6e/v7x), f32 accumulate.
    out3 = jax.block_until_ready(value_forward(x, packed, bf16_matmul=True))
    assert jnp.allclose(out3, ref, atol=5e-2, rtol=5e-2)

    print("KERNEL_OK")
</pallas_src>

<mosaic_0001>
module attributes {stable_mosaic.version = 11 : i64} {
  func.func @_value_mlp_kernel(%arg0: i32, %arg1: memref<64x32xf32, #tpu.memory_space<vmem>>, %arg2: memref<32x128xf32, #tpu.memory_space<vmem>>, %arg3: memref<1x128xf32, #tpu.memory_space<vmem>>, %arg4: memref<128x128xf32, #tpu.memory_space<vmem>>, %arg5: memref<1x128xf32, #tpu.memory_space<vmem>>, %arg6: memref<1x128xf32, #tpu.memory_space<vmem>>, %arg7: memref<1xf32, #tpu.memory_space<smem>>, %arg8: memref<8x64xf32, #tpu.memory_space<vmem>>) attributes {dimension_semantics = [#tpu.dimension_semantics<parallel>], iteration_bounds = array<i64: 1>, scalar_prefetch = 0 : i64, scratch_operands = 0 : i64, tpu.core_type = #tpu.core_type<tc>, window_params = [{transform_indices = @transform_0, window_bounds = array<i64: 64, 32>}, {pipeline_mode = #tpu.pipeline_mode<synchronous>, transform_indices = @transform_1, window_bounds = array<i64: 32, 128>}, {pipeline_mode = #tpu.pipeline_mode<synchronous>, transform_indices = @transform_2, window_bounds = array<i64: 1, 128>}, {pipeline_mode = #tpu.pipeline_mode<synchronous>, transform_indices = @transform_3, window_bounds = array<i64: 128, 128>}, {pipeline_mode = #tpu.pipeline_mode<synchronous>, transform_indices = @transform_4, window_bounds = array<i64: 1, 128>}, {pipeline_mode = #tpu.pipeline_mode<synchronous>, transform_indices = @transform_5, window_bounds = array<i64: 1, 128>}, {transform_indices = @transform_6, window_bounds = array<i64: 1>}, {transform_indices = @transform_7, window_bounds = array<i64: 8, 64>}]} {
    %c0 = arith.constant 0 : index
    %c0_0 = arith.constant 0 : index
    %0 = vector.load %arg1[%c0, %c0_0] : memref<64x32xf32, #tpu.memory_space<vmem>>, vector<64x32xf32>
    %c0_1 = arith.constant 0 : index
    %c0_2 = arith.constant 0 : index
    %1 = vector.load %arg2[%c0_1, %c0_2] : memref<32x128xf32, #tpu.memory_space<vmem>>, vector<32x128xf32>
    %c0_3 = arith.constant 0 : index
    %c0_4 = arith.constant 0 : index
    %2 = vector.load %arg4[%c0_3, %c0_4] : memref<128x128xf32, #tpu.memory_space<vmem>>, vector<128x128xf32>
    %cst = arith.constant dense<0.000000e+00> : vector<64x128xf32>
    %3 = tpu.matmul %0, %1, %cst {dimension_numbers = #tpu.dot_dimension_numbers<[1], [0], [0], [1], [0, 0, 1, 1], [], []>} : vector<64x32xf32>, vector<32x128xf32>, vector<64x128xf32> -> vector<64x128xf32>
    %c0_5 = arith.constant 0 : index
    %c0_6 = arith.constant 0 : index
    %4 = vector.load %arg3[%c0_5, %c0_6] : memref<1x128xf32, #tpu.memory_space<vmem>>, vector<1x128xf32>
    %5 = vector.broadcast %4 : vector<1x128xf32> to vector<64x128xf32>
    %6 = arith.addf %3, %5 : vector<64x128xf32>
    %cst_7 = arith.constant 0.000000e+00 : f32
    %7 = vector.broadcast %cst_7 : f32 to vector<64x128xf32>
    %8 = arith.maximumf %6, %7 : vector<64x128xf32>
    %cst_8 = arith.constant dense<0.000000e+00> : vector<64x128xf32>
    %9 = tpu.matmul %8, %2, %cst_8 {dimension_numbers = #tpu.dot_dimension_numbers<[1], [0], [0], [1], [0, 0, 1, 1], [], []>} : vector<64x128xf32>, vector<128x128xf32>, vector<64x128xf32> -> vector<64x128xf32>
    %c0_9 = arith.constant 0 : index
    %c0_10 = arith.constant 0 : index
    %10 = vector.load %arg5[%c0_9, %c0_10] : memref<1x128xf32, #tpu.memory_space<vmem>>, vector<1x128xf32>
    %11 = vector.broadcast %10 : vector<1x128xf32> to vector<64x128xf32>
    %12 = arith.addf %9, %11 : vector<64x128xf32>
    %cst_11 = arith.constant 0.000000e+00 : f32
    %13 = vector.broadcast %cst_11 : f32 to vector<64x128xf32>
    %14 = arith.maximumf %12, %13 : vector<64x128xf32>
    %c0_12 = arith.constant 0 : index
    %c0_13 = arith.constant 0 : index
    %15 = vector.load %arg6[%c0_12, %c0_13] : memref<1x128xf32, #tpu.memory_space<vmem>>, vector<1x128xf32>
    "tpu.trace_start"() <{level = 10 : i32, message = "ih,bh->ib"}> : () -> ()
    %cst_14 = arith.constant dense<0.000000e+00> : vector<1x64xf32>
    %16 = tpu.matmul %15, %14, %cst_14 {dimension_numbers = #tpu.dot_dimension_numbers<[1], [1], [0], [0], [0, 0, 1, 0], [], []>} : vector<1x128xf32>, vector<64x128xf32>, vector<1x64xf32> -> vector<1x64xf32>
    "tpu.trace_stop"() : () -> ()
    %c0_15 = arith.constant 0 : index
    %17 = memref.load %arg7[%c0_15] : memref<1xf32, #tpu.memory_space<smem>>
    %18 = vector.broadcast %17 : f32 to vector<1x64xf32>
    %19 = arith.addf %16, %18 : vector<1x64xf32>
    %20 = vector.shape_cast %19 : vector<1x64xf32> to vector<1x64xf32>
    %21 = vector.broadcast %20 : vector<1x64xf32> to vector<8x64xf32>
    %c0_16 = arith.constant 0 : index
    %c0_17 = arith.constant 0 : index
    %22 = vector.load %arg8[%c0_16, %c0_17] : memref<8x64xf32, #tpu.memory_space<vmem>>, vector<8x64xf32>
    tpu.vector_store %arg8[%c0_16, %c0_17], %21 {strides = array<i32>} : memref<8x64xf32, #tpu.memory_space<vmem>>, vector<8x64xf32>,
    return
  }
  func.func @transform_0(%arg0: i32) -> (i32, i32) {
    %c0_i32 = arith.constant 0 : i32
    %c0_i32_0 = arith.constant 0 : i32
    return %arg0, %c0_i32 : i32, i32
  }
  func.func @transform_1(%arg0: i32) -> (i32, i32) {
    %c0_i32 = arith.constant 0 : i32
    %c0_i32_0 = arith.constant 0 : i32
    %c0_i32_1 = arith.constant 0 : i32
    return %c0_i32, %c0_i32_0 : i32, i32
  }
  func.func @transform_2(%arg0: i32) -> (i32, i32) {
    %c0_i32 = arith.constant 0 : i32
    %c0_i32_0 = arith.constant 0 : i32
    %c0_i32_1 = arith.constant 0 : i32
    return %c0_i32, %c0_i32_0 : i32, i32
  }
  func.func @transform_3(%arg0: i32) -> (i32, i32) {
    %c0_i32 = arith.constant 0 : i32
    %c0_i32_0 = arith.constant 0 : i32
    %c0_i32_1 = arith.constant 0 : i32
    return %c0_i32, %c0_i32_0 : i32, i32
  }
  func.func @transform_4(%arg0: i32) -> (i32, i32) {
    %c0_i32 = arith.constant 0 : i32
    %c0_i32_0 = arith.constant 0 : i32
    %c0_i32_1 = arith.constant 0 : i32
    return %c0_i32, %c0_i32_0 : i32, i32
  }
  func.func @transform_5(%arg0: i32) -> (i32, i32) {
    %c0_i32 = arith.constant 0 : i32
    %c0_i32_0 = arith.constant 0 : i32
    %c0_i32_1 = arith.constant 0 : i32
    return %c0_i32, %c0_i32_0 : i32, i32
  }
  func.func @transform_6(%arg0: i32) -> i32 {
    %c0_i32 = arith.constant 0 : i32
    %c0_i32_0 = arith.constant 0 : i32
    return %c0_i32 : i32
  }
  func.func @transform_7(%arg0: i32) -> (i32, i32) {
    %c0_i32 = arith.constant 0 : i32
    %c0_i32_0 = arith.constant 0 : i32
    return %c0_i32, %arg0 : i32, i32
  }
}

</mosaic_0001>

<bundles_post_ra>
// kernel: tpu_custom_call.1
= control target key start
LH: loop header
LB: loop body
LE: loop exit
PB: predicated region body
PF: predicated region fallthrough
CT: control target
= control target key end

     0   :  { %13 = vsyncpa [#allocation4], 0  ;;  %s434_s0 = inlined_call_operand.vmem [shape: f32[64,32], index: 0, kind: input, shape index: {}]   ;;  %s435_s1 = inlined_call_operand.vmem [shape: f32[32,128], index: 1, kind: input, shape index: {}]   ;;  %s436_s2 = inlined_call_operand.vmem [shape: f32[1,128], index: 2, kind: input, shape index: {}]   ;;  %s437_s3 = inlined_call_operand.hbm [shape: f32[128,128], index: 3, kind: input, shape index: {}]   ;;  %s438_s4 = inlined_call_operand.vmem [shape: f32[1,128], index: 4, kind: input, shape index: {}]   ;;  %s439_s5 = inlined_call_operand.vmem [shape: f32[1,128], index: 5, kind: input, shape index: {}]   ;;  %s440_s6 = inlined_call_operand.<no memory space> [shape: f32[1], index: 6, kind: input, shape index: {}]   ;;  %s441_s7 = inlined_call_operand.hbm [shape: f32[8,64], index: 7, kind: output, shape index: {}]  }
   0x1   :  { %14 = vsyncpa [#allocation5], 0  ;;  %s25_s26 = sshll.u32 %s437_s3, 4  ;;  %s328_s27 = smov [#allocation3]   ;;  %s26_s26 = int_to_ptr.hbm [resolvable:$true] %s25_s26 }
   0x2   :  { %s27_s28 = sshll.u32 %s328_s27, 4  ;;  %s329_s29 = smov 128   ;;  %s28_s28 = int_to_ptr.vmem [resolvable:$true] %s27_s28 }
   0x3   :  { %s330_s30 = smov 8  }
   0x4   :  { %33 = dma.hbm_to_vmem [thread:$0]  %s26_s26, 2048, %s28_s28, [#allocation4], %s329_s29, %s329_s29, %s330_s30  }
   0x5   :  { %324 = dma.done.wait [#allocation4], 2048  }
   0x6   :  { %325 = vsyncadd [#allocation4], 4294965248  ;;  %v55_v0 = vld [vmem:[%s435_s1 + $0x18] sm:$0xff]  ;;  %v54_v1 = vld [vmem:[%s435_s1 + $0x10] sm:$0xff]  ;;  %vm76_vm0 = vcmask 261120   ;;  %s331_s12 = smov [#allocation6]  }
   0x7   :  { %113 = vmatpush.msra.mxu0 %v55_v0  ;;  %v53_v2 = vld [vmem:[%s435_s1 + $0x8] sm:$0xff]  ;;  %v52_v3 = vld [vmem:[%s435_s1] sm:$0xff]  ;;  %v46_v6 = vld [vmem:[%s434_s0 + $0x10] sm:$0xff]  ;;  %s234_s3 = sshll.u32 %s331_s12, 4  ;;  %s236_s15 = sshll.u32 %s441_s7, 4  ;;  %vm227_vm1 = vcmask 523264   ;;  %s235_s3 = int_to_ptr.vmem [resolvable:$true] %s234_s3  ;;  %s237_s15 = int_to_ptr.hbm [resolvable:$true] %s236_s15 }
   0x8   :  { %v44_v4 = vld [vmem:[%s434_s0] sm:$0xff]  ;;  %v45_v5 = vld [vmem:[%s434_s0 + $0x8] sm:$0xff]  ;;  %v47_v7 = vld [vmem:[%s434_s0 + $0x18] sm:$0xff] }
   0x9   :  { %114 = vmatpush.msra.mxu0 %v54_v1  ;;  %v71_v8 = vld [vmem:[#allocation3 + $0x78] sm:$0xff]  ;;  %v70_v9 = vld [vmem:[#allocation3 + $0x70] sm:$0xff]  ;;  %v69_v10 = vld [vmem:[#allocation3 + $0x68] sm:$0xff] }
   0xa   :  { %154 = vmatpush.msra.mxu1 %v71_v8  ;;  %254 = vmatpush.msra.mxu3 %v71_v8  ;;  %v68_v11 = vld [vmem:[#allocation3 + $0x60] sm:$0xff]  ;;  %v67_v13 = vld [vmem:[#allocation3 + $0x58] sm:$0xff]  ;;  %v66_v14 = vld [vmem:[#allocation3 + $0x50] sm:$0xff] }
   0xb   :  { %115 = vmatpush.msra.mxu0 %v53_v2  ;;  %v48_v12 = vld [vmem:[%s434_s0 + $0x20] sm:$0xff]  ;;  %v65_v15 = vld [vmem:[#allocation3 + $0x48] sm:$0xff]  ;;  %v63_v18 = vld [vmem:[#allocation3 + $0x38] sm:$0xff] }
   0xc   :  { %155 = vmatpush.msra.mxu1 %v70_v9  ;;  %255 = vmatpush.msra.mxu3 %v70_v9  ;;  %v64_v16 = vld [vmem:[#allocation3 + $0x40] sm:$0xff]  ;;  %v49_v17 = vld [vmem:[%s434_s0 + $0x28] sm:$0xff]  ;;  %v62_v19 = vld [vmem:[#allocation3 + $0x30] sm:$0xff] }
   0xd   :  { %116 = vmatpush.msra.mxu0 %v52_v3  ;;  %v61_v20 = vld [vmem:[#allocation3 + $0x28] sm:$0xff]  ;;  %v60_v21 = vld [vmem:[#allocation3 + $0x20] sm:$0xff]  ;;  %v50_v22 = vld [vmem:[%s434_s0 + $0x30] sm:$0xff] }
   0xe   :  { %246 = vmatmul.msk.f32.vlgmr.msra.gmra.mxu0 %vm76_vm0, %v44_v4  ;;  %156 = vmatpush.msra.mxu1 %v69_v10  ;;  %v59_v23 = vld [vmem:[#allocation3 + $0x18] sm:$0xff]  ;;  %v58_v25 = vld [vmem:[#allocation3 + $0x10] sm:$0xff]  ;;  %v57_v26 = vld [vmem:[#allocation3 + $0x8] sm:$0xff] }
   0xf   :  { %256 = vmatpush.msra.mxu3 %v69_v10  ;;  %v51_v24 = vld [vmem:[%s434_s0 + $0x38] sm:$0xff]  ;;  %v56_v27 = vld [vmem:[#allocation3] sm:$0xff] }
  0x10   :  { %157 = vmatpush.msra.mxu1 %v68_v11  ;;  %v274_v28 = vld [vmem:[%s436_s2] ss:$0 sm:$0xff] }
  0x11   :  { %257 = vmatpush.msra.mxu3 %v68_v11  ;;  %v275_v58 = vld [vmem:[%s438_s4] ss:$0 sm:$0xff] }
  0x12   :  { %158 = vmatpush.msra.mxu1 %v67_v13 }
  0x13   :  { %258 = vmatpush.msra.mxu3 %v67_v13 }
  0x14   :  { %159 = vmatpush.msra.mxu1 %v66_v14 }
  0x15   :  { %259 = vmatpush.msra.mxu3 %v66_v14  ;;  %v203_v14 = vld [vmem:[%s439_s5] sm:$0x1] }
  0x16   :  { %247 = vmatmul.msk.f32.gmra.mxu0 %vm76_vm0, %v45_v5  ;;  %160 = vmatpush.msra.mxu1 %v65_v15 }
  0x17   :  { %260 = vmatpush.msra.mxu3 %v65_v15  ;;  %v205_v15 = vstv %s440_s6 }
  0x18   :  { %161 = vmatpush.msra.mxu1 %v64_v16 }
  0x19   :  { %261 = vmatpush.msra.mxu3 %v64_v16 }
  0x1a   :  { %162 = vmatpush.msra.mxu1 %v63_v18 }
  0x1b   :  { %262 = vmatpush.msra.mxu3 %v63_v18 }
  0x1c   :  { %163 = vmatpush.msra.mxu1 %v62_v19 }
  0x1d   :  { %263 = vmatpush.msra.mxu3 %v62_v19 }
  0x1e   :  { %248 = vmatmul.msk.f32.gmra.mxu0 %vm76_vm0, %v46_v6  ;;  %164 = vmatpush.msra.mxu1 %v61_v20 }
  0x1f   :  { %264 = vmatpush.msra.mxu3 %v61_v20 }
  0x20   :  { %165 = vmatpush.msra.mxu1 %v60_v21 }
  0x21   :  { %265 = vmatpush.msra.mxu3 %v60_v21 }
  0x22   :  { %166 = vmatpush.msra.mxu1 %v59_v23 }
  0x23   :  { %266 = vmatpush.msra.mxu3 %v59_v23 }
  0x24   :  { %167 = vmatpush.msra.mxu1 %v58_v25 }
  0x25   :  { %267 = vmatpush.msra.mxu3 %v58_v25 }
  0x26   :  { %249 = vmatmul.msk.f32.gmra.mxu0 %vm76_vm0, %v47_v7  ;;  %168 = vmatpush.msra.mxu1 %v57_v26 }
  0x27   :  { %268 = vmatpush.msra.mxu3 %v57_v26 }
  0x28   :  { %169 = vmatpush.msra.mxu1 %v56_v27 }
  0x29   :  { %269 = vmatpush.msra.mxu3 %v56_v27 }
  0x2e   :  { %250 = vmatmul.msk.f32.gmra.mxu0 %vm76_vm0, %v48_v12 }
  0x36   :  { %251 = vmatmul.msk.f32.gmra.mxu0 %vm76_vm0, %v49_v17 }
  0x3e   :  { %252 = vmatmul.msk.f32.gmra.mxu0 %vm76_vm0, %v50_v22 }
  0x46   :  { %253 = vmatmul.msk.f32.gmra.mxu0 %vm76_vm0, %v51_v24 }
  0x8b   :  { %v118_v29 = vpop.f32.mrf.mxu0 }
  0x8c   :  { %v119_v30 = vadd.f32 %v274_v28, %v118_v29 }
  0x8e   :  { %v142_v31 = vmax.f32 %v119_v30, 0.0 }
  0x90   :  { %170 = vmatmul.f32.vlgmr.msra.gmra.mxu1 %v142_v31 }
  0x93   :  { %v121_v32 = vpop.f32.mrf.mxu0 }
  0x94   :  { %v122_v33 = vadd.f32 %v274_v28, %v121_v32 }
  0x96   :  { %v143_v34 = vmax.f32 %v122_v33, 0.0 }
  0x98   :  { %173 = vmatmul.f32.gmra.mxu1 %v143_v34 }
  0x9b   :  { %v124_v35 = vpop.f32.mrf.mxu0 }
  0x9c   :  { %v125_v36 = vadd.f32 %v274_v28, %v124_v35 }
  0x9e   :  { %v144_v37 = vmax.f32 %v125_v36, 0.0 }
  0xa0   :  { %176 = vmatmul.f32.gmra.mxu1 %v144_v37 }
  0xa3   :  { %v127_v38 = vpop.f32.mrf.mxu0 }
  0xa4   :  { %v128_v39 = vadd.f32 %v274_v28, %v127_v38 }
  0xa6   :  { %v145_v40 = vmax.f32 %v128_v39, 0.0 }
  0xa8   :  { %179 = vmatmul.f32.gmra.mxu1 %v145_v40 }
  0xab   :  { %v130_v41 = vpop.f32.mrf.mxu0 }
  0xac   :  { %v131_v42 = vadd.f32 %v274_v28, %v130_v41 }
  0xae   :  { %v146_v43 = vmax.f32 %v131_v42, 0.0 }
  0xb0   :  { %182 = vmatmul.f32.vlgmr.msra.gmra.mxu3 %v146_v43 }
  0xb3   :  { %v133_v44 = vpop.f32.mrf.mxu0 }
  0xb4   :  { %v134_v45 = vadd.f32 %v274_v28, %v133_v44 }
  0xb6   :  { %v147_v46 = vmax.f32 %v134_v45, 0.0 }
  0xb8   :  { %185 = vmatmul.f32.gmra.mxu3 %v147_v46 }
  0xbb   :  { %v136_v47 = vpop.f32.mrf.mxu0 }
  0xbc   :  { %v137_v48 = vadd.f32 %v274_v28, %v136_v47 }
  0xbe   :  { %v148_v49 = vmax.f32 %v137_v48, 0.0 }
  0xc0   :  { %188 = vmatmul.f32.gmra.mxu3 %v148_v49 }
  0xc3   :  { %v139_v50 = vpop.f32.mrf.mxu0 }
  0xc4   :  { %v140_v51 = vadd.f32 %v274_v28, %v139_v50 }
  0xc6   :  { %v149_v52 = vmax.f32 %v140_v51, 0.0 }
  0xc8   :  { %191 = vmatmul.f32.gmra.mxu3 %v149_v52 }
 0x10d   :  { %v171_v54 = vpop.f32.mrf.mxu1 }
 0x10e   :  { %v172_v11 = vadd.f32 %v275_v58, %v171_v54 }
 0x110   :  { %v195_v13 = vmax.f32 %v172_v11, 0.0 }
 0x115   :  { %v174_v56 = vpop.f32.mrf.mxu1 }
 0x116   :  { %v175_v9 = vadd.f32 %v275_v58, %v174_v56 }
 0x118   :  { %v196_v12 = vmax.f32 %v175_v9, 0.0 }
 0x11d   :  { %v177_v61 = vpop.f32.mrf.mxu1 }
 0x11e   :  { %v178_v7 = vadd.f32 %v275_v58, %v177_v61 }
 0x120   :  { %v197_v10 = vmax.f32 %v178_v7, 0.0 }
 0x125   :  { %v180_v4 = vpop.f32.mrf.mxu1 }
 0x126   :  { %v181_v5 = vadd.f32 %v275_v58, %v180_v4 }
 0x128   :  { %v198_v8 = vmax.f32 %v181_v5, 0.0 }
 0x133   :  { %v183_v53 = vpop.f32.mrf.mxu3 }
 0x134   :  { %v184_v2 = vadd.f32 %v275_v58, %v183_v53 }
 0x136   :  { %v199_v6 = vmax.f32 %v184_v2, 0.0 }
 0x13b   :  { %v186_v55 = vpop.f32.mrf.mxu3 }
 0x13c   :  { %v187_v0 = vadd.f32 %v275_v58, %v186_v55 }
 0x13e   :  { %v200_v3 = vmax.f32 %v187_v0, 0.0 }
 0x143   :  { %v189_v57 = vpop.f32.mrf.mxu3 }
 0x144   :  { %v190_v62 = vadd.f32 %v275_v58, %v189_v57 }
 0x146   :  { %v201_v1 = vmax.f32 %v190_v62, 0.0 }
 0x14b   :  { %v192_v59 = vpop.f32.mrf.mxu3 }
 0x14c   :  { %v193_v60 = vadd.f32 %v275_v58, %v192_v59 }
 0x14e   :  { %v202_v63 = vmax.f32 %v193_v60, 0.0 }
 0x150   :  { %214 = vmatpush.xpose.msra.mxu2 %v202_v63 }
 0x154   :  { %215 = vmatpush.xpose.msra.mxu2 %v201_v1 }
 0x158   :  { %216 = vmatpush.xpose.msra.mxu2 %v200_v3 }
 0x15c   :  { %217 = vmatpush.xpose.msra.mxu2 %v199_v6 }
 0x160   :  { %218 = vmatpush.xpose.msra.mxu2 %v198_v8 }
 0x164   :  { %219 = vmatpush.xpose.msra.mxu2 %v197_v10 }
 0x168   :  { %220 = vmatpush.xpose.msra.mxu2 %v196_v12 }
 0x16c   :  { %221 = vmatpush.xpose.msra.mxu2 %v195_v13 }
 0x16f   :  { %222 = vmatmul.f32.vlgmr.msra.gmra.mxu2 %v203_v14 }
 0x1f2   :  { %v223_v16 = vpop.f32.mrf.mxu2 }
 0x1f3   :  { %v224_v17 = vadd.f32 %v223_v16, %v205_v15 }
 0x1f5   :  { %v226_v18 = vperm.slane %v224_v17, 0 }
 0x1f7   :  { %228 = vst.msk [vmem:[#allocation6] sm:$0xff] %vm227_vm1, %v226_v18 }
 0x1f8   :  { %239 = dma.vmem_to_hbm [thread:$0]  %s235_s3, 128, %s237_s15, [#allocation5]  }
 0x1f9   :  { %326 = dma.done.wait [#allocation5], 128  }
 0x1fa   :  { %327 = vsyncadd [#allocation5], 4294967168 }
 0x1fb   :  { %244 = vsyncpa [#allocation4], 1 }
 0x1fc   :  { %245 = vsyncpa [#allocation5], 1 }

</bundles_post_ra>
